<compile_context>
chip_gen: v7x
topology: tpu7x:2x2x1
jax: 0.10.0
libtpu: 0.0.40
codegen_flags: <defaults>
</compile_context>

<pallas_src>
import functools
import math

import jax
import jax.numpy as jnp
from jax.experimental import pallas as pl
from jax.experimental.pallas import tpu as pltpu


def make_positional_encoding(d_model, max_len=5000, dtype=jnp.float32):
    """Build the `pe` buffer exactly as the PyTorch __init__ (even d_model)."""
    # PyTorch's 0::2 / 1::2 assignment errors on odd d_model; mirror that.
    assert d_model % 2 == 0, "d_model must be even (matches PyTorch module)"
    position = jnp.arange(0, max_len, dtype=jnp.float32)[:, None]          # (max_len, 1)
    div_term = jnp.exp(jnp.arange(0, d_model, 2, dtype=jnp.float32)
                       * (-math.log(10000.0) / d_model))                   # (d_model/2,)
    args = position * div_term                                             # (max_len, d_model/2)
    # Interleave sin (even feature indices) and cos (odd feature indices).
    pe = jnp.stack([jnp.sin(args), jnp.cos(args)], axis=-1).reshape(max_len, d_model)
    pe = pe[:, None, :]                                                    # (max_len, 1, d_model)
    return pe.astype(dtype)


def _pe_add_kernel(x_ref, pe_ref, o_ref, *, batch, d_model, lane_chunked):
    # x_ref/o_ref: (ts, B*D) lane-dense slab; pe_ref: (ts, D).
    # Add is done in f32 (strict parity with PyTorch's f32 pe buffer).
    pe_f32 = pe_ref[...].astype(jnp.float32)
    if lane_chunked:
        # D is a multiple of 128: per-batch-group adds at 128-aligned static
        # lane offsets. Avoids the (ts, B*D) tiled-pe VMEM temp and the XLU
        # lane-replication work entirely.
        for b in range(batch):
            lo = b * d_model
            xb = x_ref[:, lo:lo + d_model].astype(jnp.float32)
            o_ref[:, lo:lo + d_model] = (xb + pe_f32).astype(o_ref.dtype)
    else:
        # Fallback: lane-replicate pe across batch groups of the merged (B*D)
        # axis -- output lane j needs pe[:, j % D], which is jnp.tile((1, B)).
        pe_b = jnp.tile(pe_f32, (1, batch)) if batch > 1 else pe_f32
        o_ref[...] = (x_ref[...].astype(jnp.float32) + pe_b).astype(o_ref.dtype)
    # TODO(synk): if a dropout stage follows this module, fuse it here
    # (pltpu.prng_seed + pltpu.prng_random_bits) to save an HBM round trip.


def _derive_vmem_limit_bytes():
    """Generation-aware scoped-VMEM limit with headroom for Mosaic scratch."""
    cap = 0
    try:
        info = pltpu.get_tpu_info()
        cap = int(getattr(info, "vmem_capacity_bytes", 0) or 0)
    except Exception:
        cap = 0
    if cap <= 0:
        cap = 64 << 20  # conservative default: v7x per-TC VMEM
    # <= 75% of physical, minus 16 MiB headroom, capped at 64 MiB (plenty for a
    # mem-bound add), floored at the 32 MiB default scoped limit.
    #   v7x (64 MiB/TC)      -> 48 MiB
    #   v5e/v6e (128 MiB/TC) -> 64 MiB
    limit = min(int(cap * 0.75), cap - (16 << 20), 64 << 20)
    return max(limit, 32 << 20)


def positional_encoding_forward(x, pe, *, seq_tile=None, vmem_limit_bytes=None,
                                donate_x=False):
    """x: (S, B, D), pe: (max_len, 1, D). Returns x + pe[:S] (broadcast over B)."""
    S, B, D = x.shape
    max_len = pe.shape[0]
    assert pe.shape == (max_len, 1, D) and max_len >= S

    # Metadata-only reshapes (row-major contiguous): merge (B, D) into one
    # lane-dense axis; drop pe's size-1 batch dim. pe stays in its own dtype
    # (no per-call HBM cast/copy of the full max_len buffer).
    x2d = x.reshape(S, B * D)
    pe2d = pe.reshape(max_len, D)

    x_item = jnp.dtype(x.dtype).itemsize
    pe_item = jnp.dtype(pe.dtype).itemsize
    # dtype-native sublane multiple: f32 -> 8, bf16 -> 16, int8/fp8 -> 32.
    sublane = max(8, 32 // x_item)

    lane_chunked = (D % 128 == 0)

    if vmem_limit_bytes is None:
        vmem_limit_bytes = _derive_vmem_limit_bytes()
    # Leave slack inside the scoped limit for Mosaic internal scratch.
    working_set = max(int(vmem_limit_bytes * 0.75), 16 << 20)

    if seq_tile is None:
        # Per-row working set:
        #   * double-buffered pipeline tiles: 2 * (x + out + pe)
        #   * in-kernel f32 temps: broadcast/tile temp + casts (tile path) or
        #     small per-group temps (chunked path).
        per_row_io = 2 * (2 * B * D * x_item + D * pe_item)
        per_row_tmp = (3 * D * 4) if lane_chunked else ((2 * B * D + D) * 4)
        per_row = per_row_io + per_row_tmp
        ts = max(int(working_set // per_row), 1)
        # Megacore / pipeline: keep at least 2 grid steps for non-tiny S so the
        # "parallel" axis can shard across the two v7x TensorCores.
        if S >= 2 * sublane:
            half = pl.cdiv(S, 2)
            ts = min(ts, pl.cdiv(half, sublane) * sublane)
    else:
        ts = max(int(seq_tile), 1)

    if ts >= S:
        ts = S                                            # full-extent block always legal
    else:
        ts = max((ts // sublane) * sublane, min(sublane, S))

    grid = (pl.cdiv(S, ts),)

    cost = pl.CostEstimate(
        flops=S * B * D,
        transcendentals=0,
        bytes_accessed=2 * S * B * D * x_item + S * D * pe_item,
    )

    out2d = pl.pallas_call(
        functools.partial(_pe_add_kernel, batch=B, d_model=D,
                          lane_chunked=lane_chunked),
        out_shape=jax.ShapeDtypeStruct((S, B * D), x.dtype),
        grid_spec=pltpu.PrefetchScalarGridSpec(
            num_scalar_prefetch=0,
            grid=grid,
            in_specs=[
                pl.BlockSpec((ts, B * D), lambda i: (i, 0)),   # x slab (lane-dense)
                pl.BlockSpec((ts, D), lambda i: (i, 0)),       # pe rows (no size-1 dim)
            ],
            out_specs=pl.BlockSpec((ts, B * D), lambda i: (i, 0)),
        ),
        compiler_params=pltpu.CompilerParams(
            dimension_semantics=("parallel",),
            vmem_limit_bytes=int(vmem_limit_bytes),
        ),
        cost_estimate=cost,
        input_output_aliases=({0: 0} if donate_x else {}),
    )(x2d, pe2d)

    return out2d.reshape(S, B, D)


if __name__ == "__main__":
    key = jax.random.PRNGKey(0)

    # Test 1: small shapes consistent with the module (seq, batch, d_model);
    # D not a multiple of 128 -> jnp.tile broadcast path.
    S, B, D = 8, 2, 32
    max_len = 64
    pe = make_positional_encoding(D, max_len=max_len, dtype=jnp.float32)
    x = jax.random.normal(key, (S, B, D), dtype=jnp.float32)
    out = jax.block_until_ready(positional_encoding_forward(x, pe))
    ref = x + pe[:S]
    assert out.shape == (S, B, D)
    assert jnp.allclose(out, ref, atol=1e-6, rtol=1e-6)

    # Test 2: D % 128 == 0 -> lane-chunked per-batch-group path; multi-block
    # grid with a partial boundary block (S not a multiple of the tile).
    S2, B2, D2 = 20, 2, 128
    pe2 = make_positional_encoding(D2, max_len=max_len, dtype=jnp.float32)
    x2 = jax.random.normal(jax.random.PRNGKey(1), (S2, B2, D2), dtype=jnp.float32)
    out2 = jax.block_until_ready(positional_encoding_forward(x2, pe2, seq_tile=8))
    ref2 = x2 + pe2[:S2]
    assert jnp.allclose(out2, ref2, atol=1e-6, rtol=1e-6)

    # Test 3: bf16 activations with f32 pe buffer: no wrapper-side cast of the
    # full pe, add in f32 in-kernel, output cast to bf16.
    x3 = x.astype(jnp.bfloat16)
    out3 = jax.block_until_ready(positional_encoding_forward(x3, pe))
    ref3 = (x3.astype(jnp.float32) + pe[:S]).astype(jnp.bfloat16)
    assert out3.dtype == jnp.bfloat16
    assert jnp.allclose(out3.astype(jnp.float32), ref3.astype(jnp.float32),
                        atol=1e-2, rtol=1e-2)

    print("KERNEL_OK")
</pallas_src>

<mosaic_0001>
module attributes {stable_mosaic.version = 11 : i64} {
  func.func @_pe_add_kernel(%arg0: i32, %arg1: memref<8x64xf32, #tpu.memory_space<vmem>>, %arg2: memref<8x32xf32, #tpu.memory_space<vmem>>, %arg3: memref<8x64xf32, #tpu.memory_space<vmem>>) attributes {dimension_semantics = [#tpu.dimension_semantics<parallel>], iteration_bounds = array<i64: 1>, scalar_prefetch = 0 : i64, scratch_operands = 0 : i64, tpu.core_type = #tpu.core_type<tc>, window_params = [{transform_indices = @transform_0, window_bounds = array<i64: 8, 64>}, {transform_indices = @transform_1, window_bounds = array<i64: 8, 32>}, {transform_indices = @transform_2, window_bounds = array<i64: 8, 64>}]} {
    %c0 = arith.constant 0 : index
    %c0_0 = arith.constant 0 : index
    %0 = vector.load %arg2[%c0, %c0_0] : memref<8x32xf32, #tpu.memory_space<vmem>>, vector<8x32xf32>
    %1 = tpu.concatenate %0, %0 in 1 : vector<8x32xf32>, vector<8x32xf32> -> vector<8x64xf32>
    %c0_1 = arith.constant 0 : index
    %c0_2 = arith.constant 0 : index
    %2 = vector.load %arg1[%c0_1, %c0_2] : memref<8x64xf32, #tpu.memory_space<vmem>>, vector<8x64xf32>
    %3 = arith.addf %2, %1 : vector<8x64xf32>
    %c0_3 = arith.constant 0 : index
    %c0_4 = arith.constant 0 : index
    %4 = vector.load %arg3[%c0_3, %c0_4] : memref<8x64xf32, #tpu.memory_space<vmem>>, vector<8x64xf32>
    tpu.vector_store %arg3[%c0_3, %c0_4], %3 {strides = array<i32>} : memref<8x64xf32, #tpu.memory_space<vmem>>, vector<8x64xf32>,
    return
  }
  func.func @transform_0(%arg0: i32) -> (i32, i32) {
    %c0_i32 = arith.constant 0 : i32
    %c0_i32_0 = arith.constant 0 : i32
    return %arg0, %c0_i32 : i32, i32
  }
  func.func @transform_1(%arg0: i32) -> (i32, i32) {
    %c0_i32 = arith.constant 0 : i32
    %c0_i32_0 = arith.constant 0 : i32
    return %arg0, %c0_i32 : i32, i32
  }
  func.func @transform_2(%arg0: i32) -> (i32, i32) {
    %c0_i32 = arith.constant 0 : i32
    %c0_i32_0 = arith.constant 0 : i32
    return %arg0, %c0_i32 : i32, i32
  }
}

</mosaic_0001>

<bundles_post_ra>
// kernel: tpu_custom_call.1
= control target key start
LH: loop header
LB: loop body
LE: loop exit
PB: predicated region body
PF: predicated region fallthrough
CT: control target
= control target key end

     0   :  { %s98_s0 = inlined_call_operand.vmem [shape: f32[8,64], index: 0, kind: input, shape index: {}]   ;;  %s99_s1 = inlined_call_operand.vmem [shape: f32[64,32], index: 1, kind: input, shape index: {}]   ;;  %s100_s2 = inlined_call_operand.hbm [shape: f32[8,64], index: 2, kind: output, shape index: {}]  }
   0x1   :  { %v12_v0 = vld [vmem:[%s99_s1] sm:$0xff] }
   0x2   :  { %7 = vsyncpa [#allocation3], 0  ;;  %s63_s11 = smov 32   ;;  %vm17_vm0 = vcmask 261120   ;;  %v19_v1 = vld [vmem:[%s98_s0] sm:$0xff]  ;;  %s64_s14 = smov [#allocation2]  }
   0x3   :  { %14 = vrot.lane.b32.xlu0 %v12_v0, %s63_s11  ;;  %s29_s15 = sshll.u32 %s64_s14, 4  ;;  %vm21_vm1 = vcmask 523264   ;;  %s30_s15 = int_to_ptr.vmem [resolvable:$true] %s29_s15 }
   0x4   :  { %s39_s16 = scalar_lea.vmem %s30_s15, 128  ;;  %p44_p1 = scmp.lt.s32.totalorder %s30_s15, %s30_s15 }
   0x5   :  { %p40_p0 = scmp.ne.s32.totalorder %s30_s15, %s39_s16  ;;  %p45_p2 = scmp.lt.s32.totalorder %s39_s16, %s39_s16 }
   0x7   :  { %p46_p3 = por %p45_p2, %p44_p1 }
   0x9   :  { %p47_p4 = pnand %p46_p3, %p40_p0 }
  0x75   :  { %v15_v2 = vpop.permute.xlu0 %14 }
  0x76   :  { %v18_v3 = vsel %vm17_vm0, %v12_v0, %v15_v2 }
  0x77   :  { %v20_v4 = vadd.f32 %v19_v1, %v18_v3 }
  0x79   :  { %22 = vst.msk [vmem:[#allocation2] sm:$0xff] %vm21_vm1, %v20_v4 }
  0x7a   :  { %50 = shalt.err (!%p47_p4)
}
  0x7b   :  { %s51_s18 = scalar_lea.hbm %s100_s2, 128 }
  0x7c   :  { %p52_p5 = scmp.ne.s32.totalorder %s100_s2, %s51_s18  ;;  %p55_p6 = scmp.lt.u32.totalorder %s51_s18, %s100_s2 }
  0x7e   :  { %p57_p7 = pnand %p55_p6, %p52_p5 }
  0x80   :  { %60 = shalt.err (!%p57_p7)
}
  0x81   :  { %32 = dma.vmem_to_hbm [thread:$0]  %s30_s15, 128, %s100_s2, [#allocation3]  }
  0x82   :  { %61 = dma.done.wait [#allocation3], 128  }
  0x83   :  { %62 = vsyncadd [#allocation3], 4294967168 }
  0x84   :  { %36 = vsyncpa [#allocation3], 1 }

</bundles_post_ra>
